<compile_context>
chip_gen: v5e
topology: v5e:2x2
jax: 0.10.0
libtpu: 0.0.40
codegen_flags: <defaults>
</compile_context>

<pallas_src>
import jax
import jax.numpy as jnp
from jax.experimental import pallas as pl
from jax.experimental.pallas import tpu as pltpu

INPUT_SIZE = 60
HIDDEN_SIZE = 10
OUTPUT_SIZE = 5


def _rnn_kernel(x_ref, h0_ref, win_ref, wout_ref, y_ref, hN_ref):
    """Single-invocation fused RNN forward (everything lives in VMEM / vregs).

    x_ref:    (T*B, I)   time-major flattened input (row t*B + b)
    h0_ref:   (B, H)     initial hidden state
    win_ref:  (I+H+1, H) packed [W_ih^T ; W_hh^T ; (b_ih+b_hh)]
    wout_ref: (H+1, O)   packed [W_out^T ; b_out]
    y_ref:    (T*B, O)   time-major flattened per-step outputs
    hN_ref:   (B, H)     final hidden state
    """
    TB, I = x_ref.shape
    B, H = hN_ref.shape
    O = wout_ref.shape[1]
    T = TB // B

    # Unpack parameters with static slices of the packed refs (one-time reads).
    wih_t = win_ref[0:I, :]               # (I, H)
    whh_t = win_ref[I:I + H, :]           # (H, H)
    b = win_ref[I + H:I + H + 1, :]       # (1, H)  = b_ih + b_hh
    wout_t = wout_ref[0:H, :]             # (H, O)
    bout = wout_ref[H:H + 1, :]           # (1, O)

    # --- Prologue: batched input projection, time-independent, one MXU call.
    #   xp[t*B + b] = x[t*B + b] @ W_ih^T + (b_ih + b_hh)
    xp = jnp.dot(x_ref[...], wih_t, preferred_element_type=jnp.float32) + b

    # Pre-extract per-step input slices (depend only on xp, not on h) so they
    # are scheduled off the serial recurrence chain.  Static row slices on the
    # time-major layout are sublane-contiguous.
    xp_steps = [xp[t * B:(t + 1) * B, :] for t in range(T)]

    # --- Recurrence: only the tiny (B,H)@(H,H) matmul + add + tanh per step.
    # T is small and static -> fully unrolled; hidden history stays in vregs.
    h = h0_ref[...]                       # (B, H)
    hs = []
    for t in range(T):
        h = jnp.tanh(xp_steps[t]
                     + jnp.dot(h, whh_t, preferred_element_type=jnp.float32))
        hs.append(h)

    # --- Epilogue: batched output head, one MXU call, single store of y.
    h_all = jnp.concatenate(hs, axis=0)   # (T*B, H), same time-major ordering
    y = jnp.dot(h_all, wout_t, preferred_element_type=jnp.float32) + bout
    y_ref[...] = y.astype(y_ref.dtype)
    hN_ref[...] = h.astype(hN_ref.dtype)


@jax.jit
def rnn_forward(x, h0, w_ih, w_hh, b_ih, b_hh, w_out, b_out):
    """x: (B, T, INPUT_SIZE), h0: (1, B, HIDDEN_SIZE). Returns ((B,T,OUT), (1,B,H))."""
    B, T, I = x.shape
    H = w_hh.shape[0]
    O = w_out.shape[0]

    # All reshapes / transposes / packing done here in the wrapper (free in XLA
    # at these sizes), so the kernel sees only 2-D, statically sliceable arrays.
    x_tm = jnp.transpose(x.astype(jnp.float32), (1, 0, 2)).reshape(T * B, I)
    h0_2d = h0[0].astype(jnp.float32)                          # (B, H)

    wih_t = w_ih.astype(jnp.float32).T                         # (I, H)
    whh_t = w_hh.astype(jnp.float32).T                         # (H, H)
    b = (b_ih + b_hh).astype(jnp.float32).reshape(1, H)        # fused bias
    win_pack = jnp.concatenate([wih_t, whh_t, b], axis=0)      # (I+H+1, H)

    wout_t = w_out.astype(jnp.float32).T                       # (H, O)
    bout = b_out.astype(jnp.float32).reshape(1, O)
    wout_pack = jnp.concatenate([wout_t, bout], axis=0)        # (H+1, O)

    # Single gridless kernel invocation; whole problem fits comfortably in VMEM.
    y_tm, h_last = pl.pallas_call(
        _rnn_kernel,
        out_shape=(
            jax.ShapeDtypeStruct((T * B, O), jnp.float32),
            jax.ShapeDtypeStruct((B, H), jnp.float32),
        ),
    )(x_tm, h0_2d, win_pack, wout_pack)

    y = jnp.transpose(y_tm.reshape(T, B, O), (1, 0, 2))        # back to batch-first
    return y, h_last[None, :, :]


def _reference(x, h0, w_ih, w_hh, b_ih, b_hh, w_out, b_out):
    """Pure-JAX reference matching nn.RNN(tanh) + per-step Linear."""
    def step(h, x_t):
        h = jnp.tanh(x_t @ w_ih.T + b_ih + h @ w_hh.T + b_hh)
        y = h @ w_out.T + b_out
        return h, y
    hN, ys = jax.lax.scan(step, h0[0], jnp.transpose(x, (1, 0, 2)))
    return jnp.transpose(ys, (1, 0, 2)), hN[None, :, :]


if __name__ == "__main__":
    B, T = 2, 8
    key = jax.random.PRNGKey(0)
    ks = jax.random.split(key, 8)

    # Deterministic parameter init (PyTorch-style U(-1/sqrt(H), 1/sqrt(H))).
    bound = 1.0 / (HIDDEN_SIZE ** 0.5)
    w_ih = jax.random.uniform(ks[0], (HIDDEN_SIZE, INPUT_SIZE), jnp.float32, -bound, bound)
    w_hh = jax.random.uniform(ks[1], (HIDDEN_SIZE, HIDDEN_SIZE), jnp.float32, -bound, bound)
    b_ih = jax.random.uniform(ks[2], (HIDDEN_SIZE,), jnp.float32, -bound, bound)
    b_hh = jax.random.uniform(ks[3], (HIDDEN_SIZE,), jnp.float32, -bound, bound)
    w_out = jax.random.uniform(ks[4], (OUTPUT_SIZE, HIDDEN_SIZE), jnp.float32, -bound, bound)
    b_out = jax.random.uniform(ks[5], (OUTPUT_SIZE,), jnp.float32, -bound, bound)

    x = jax.random.normal(ks[6], (B, T, INPUT_SIZE), jnp.float32)
    # h_state = None in the PyTorch driver -> zero initial hidden state.
    h0 = jnp.zeros((1, B, HIDDEN_SIZE), jnp.float32)

    y, hN = rnn_forward(x, h0, w_ih, w_hh, b_ih, b_hh, w_out, b_out)
    jax.block_until_ready((y, hN))

    y_ref, hN_ref = _reference(x, h0, w_ih, w_hh, b_ih, b_hh, w_out, b_out)
    assert y.shape == (B, T, OUTPUT_SIZE) and hN.shape == (1, B, HIDDEN_SIZE)
    assert jnp.allclose(y, y_ref, atol=1e-5, rtol=1e-5)
    assert jnp.allclose(hN, hN_ref, atol=1e-5, rtol=1e-5)

    print("KERNEL_OK")
</pallas_src>

<mosaic_0001>
module attributes {stable_mosaic.version = 11 : i64} {
  func.func @_rnn_kernel(%arg0: memref<16x60xf32, #tpu.memory_space<vmem>>, %arg1: memref<2x10xf32, #tpu.memory_space<vmem>>, %arg2: memref<71x10xf32, #tpu.memory_space<vmem>>, %arg3: memref<11x5xf32, #tpu.memory_space<vmem>>, %arg4: memref<16x5xf32, #tpu.memory_space<vmem>>, %arg5: memref<2x10xf32, #tpu.memory_space<vmem>>) attributes {dimension_semantics = [], scalar_prefetch = 0 : i64, scratch_operands = 0 : i64, tpu.core_type = #tpu.core_type<tc>} {
    %c0 = arith.constant 0 : index
    %c0_0 = arith.constant 0 : index
    %0 = vector.load %arg2[%c0, %c0_0] : memref<71x10xf32, #tpu.memory_space<vmem>>, vector<60x10xf32>
    %c60 = arith.constant 60 : index
    %c0_1 = arith.constant 0 : index
    %1 = vector.load %arg2[%c60, %c0_1] : memref<71x10xf32, #tpu.memory_space<vmem>>, vector<10x10xf32>
    %c70 = arith.constant 70 : index
    %c0_2 = arith.constant 0 : index
    %2 = vector.load %arg2[%c70, %c0_2] : memref<71x10xf32, #tpu.memory_space<vmem>>, vector<1x10xf32>
    %c0_3 = arith.constant 0 : index
    %c0_4 = arith.constant 0 : index
    %3 = vector.load %arg3[%c0_3, %c0_4] : memref<11x5xf32, #tpu.memory_space<vmem>>, vector<10x5xf32>
    %c10 = arith.constant 10 : index
    %c0_5 = arith.constant 0 : index
    %4 = vector.load %arg3[%c10, %c0_5] : memref<11x5xf32, #tpu.memory_space<vmem>>, vector<1x5xf32>
    %c0_6 = arith.constant 0 : index
    %c0_7 = arith.constant 0 : index
    %5 = vector.load %arg0[%c0_6, %c0_7] : memref<16x60xf32, #tpu.memory_space<vmem>>, vector<16x60xf32>
    %cst = arith.constant dense<0.000000e+00> : vector<16x10xf32>
    %6 = tpu.matmul %5, %0, %cst {dimension_numbers = #tpu.dot_dimension_numbers<[1], [0], [0], [1], [0, 0, 1, 1], [], []>} : vector<16x60xf32>, vector<60x10xf32>, vector<16x10xf32> -> vector<16x10xf32>
    %7 = vector.broadcast %2 : vector<1x10xf32> to vector<16x10xf32>
    %8 = arith.addf %6, %7 : vector<16x10xf32>
    %9 = vector.extract_strided_slice %8 {offsets = [0, 0], sizes = [2, 10], strides = [1, 1]} : vector<16x10xf32> to vector<2x10xf32>
    %10 = vector.extract_strided_slice %8 {offsets = [2, 0], sizes = [2, 10], strides = [1, 1]} : vector<16x10xf32> to vector<2x10xf32>
    %11 = vector.extract_strided_slice %8 {offsets = [4, 0], sizes = [2, 10], strides = [1, 1]} : vector<16x10xf32> to vector<2x10xf32>
    %12 = vector.extract_strided_slice %8 {offsets = [6, 0], sizes = [2, 10], strides = [1, 1]} : vector<16x10xf32> to vector<2x10xf32>
    %13 = vector.extract_strided_slice %8 {offsets = [8, 0], sizes = [2, 10], strides = [1, 1]} : vector<16x10xf32> to vector<2x10xf32>
    %14 = vector.extract_strided_slice %8 {offsets = [10, 0], sizes = [2, 10], strides = [1, 1]} : vector<16x10xf32> to vector<2x10xf32>
    %15 = vector.extract_strided_slice %8 {offsets = [12, 0], sizes = [2, 10], strides = [1, 1]} : vector<16x10xf32> to vector<2x10xf32>
    %16 = vector.extract_strided_slice %8 {offsets = [14, 0], sizes = [2, 10], strides = [1, 1]} : vector<16x10xf32> to vector<2x10xf32>
    %c0_8 = arith.constant 0 : index
    %c0_9 = arith.constant 0 : index
    %17 = vector.load %arg1[%c0_8, %c0_9] : memref<2x10xf32, #tpu.memory_space<vmem>>, vector<2x10xf32>
    %cst_10 = arith.constant dense<0.000000e+00> : vector<2x10xf32>
    %18 = tpu.matmul %17, %1, %cst_10 {dimension_numbers = #tpu.dot_dimension_numbers<[1], [0], [0], [1], [0, 0, 1, 1], [], []>} : vector<2x10xf32>, vector<10x10xf32>, vector<2x10xf32> -> vector<2x10xf32>
    %19 = arith.addf %9, %18 : vector<2x10xf32>
    %20 = math.tanh %19 : vector<2x10xf32>
    %cst_11 = arith.constant dense<0.000000e+00> : vector<2x10xf32>
    %21 = tpu.matmul %20, %1, %cst_11 {dimension_numbers = #tpu.dot_dimension_numbers<[1], [0], [0], [1], [0, 0, 1, 1], [], []>} : vector<2x10xf32>, vector<10x10xf32>, vector<2x10xf32> -> vector<2x10xf32>
    %22 = arith.addf %10, %21 : vector<2x10xf32>
    %23 = math.tanh %22 : vector<2x10xf32>
    %cst_12 = arith.constant dense<0.000000e+00> : vector<2x10xf32>
    %24 = tpu.matmul %23, %1, %cst_12 {dimension_numbers = #tpu.dot_dimension_numbers<[1], [0], [0], [1], [0, 0, 1, 1], [], []>} : vector<2x10xf32>, vector<10x10xf32>, vector<2x10xf32> -> vector<2x10xf32>
    %25 = arith.addf %11, %24 : vector<2x10xf32>
    %26 = math.tanh %25 : vector<2x10xf32>
    %cst_13 = arith.constant dense<0.000000e+00> : vector<2x10xf32>
    %27 = tpu.matmul %26, %1, %cst_13 {dimension_numbers = #tpu.dot_dimension_numbers<[1], [0], [0], [1], [0, 0, 1, 1], [], []>} : vector<2x10xf32>, vector<10x10xf32>, vector<2x10xf32> -> vector<2x10xf32>
    %28 = arith.addf %12, %27 : vector<2x10xf32>
    %29 = math.tanh %28 : vector<2x10xf32>
    %cst_14 = arith.constant dense<0.000000e+00> : vector<2x10xf32>
    %30 = tpu.matmul %29, %1, %cst_14 {dimension_numbers = #tpu.dot_dimension_numbers<[1], [0], [0], [1], [0, 0, 1, 1], [], []>} : vector<2x10xf32>, vector<10x10xf32>, vector<2x10xf32> -> vector<2x10xf32>
    %31 = arith.addf %13, %30 : vector<2x10xf32>
    %32 = math.tanh %31 : vector<2x10xf32>
    %cst_15 = arith.constant dense<0.000000e+00> : vector<2x10xf32>
    %33 = tpu.matmul %32, %1, %cst_15 {dimension_numbers = #tpu.dot_dimension_numbers<[1], [0], [0], [1], [0, 0, 1, 1], [], []>} : vector<2x10xf32>, vector<10x10xf32>, vector<2x10xf32> -> vector<2x10xf32>
    %34 = arith.addf %14, %33 : vector<2x10xf32>
    %35 = math.tanh %34 : vector<2x10xf32>
    %cst_16 = arith.constant dense<0.000000e+00> : vector<2x10xf32>
    %36 = tpu.matmul %35, %1, %cst_16 {dimension_numbers = #tpu.dot_dimension_numbers<[1], [0], [0], [1], [0, 0, 1, 1], [], []>} : vector<2x10xf32>, vector<10x10xf32>, vector<2x10xf32> -> vector<2x10xf32>
    %37 = arith.addf %15, %36 : vector<2x10xf32>
    %38 = math.tanh %37 : vector<2x10xf32>
    %cst_17 = arith.constant dense<0.000000e+00> : vector<2x10xf32>
    %39 = tpu.matmul %38, %1, %cst_17 {dimension_numbers = #tpu.dot_dimension_numbers<[1], [0], [0], [1], [0, 0, 1, 1], [], []>} : vector<2x10xf32>, vector<10x10xf32>, vector<2x10xf32> -> vector<2x10xf32>
    %40 = arith.addf %16, %39 : vector<2x10xf32>
    %41 = math.tanh %40 : vector<2x10xf32>
    %42 = tpu.concatenate %20, %23, %26, %29, %32, %35, %38, %41 in 0 : vector<2x10xf32>, vector<2x10xf32>, vector<2x10xf32>, vector<2x10xf32>, vector<2x10xf32>, vector<2x10xf32>, vector<2x10xf32>, vector<2x10xf32> -> vector<16x10xf32>
    %cst_18 = arith.constant dense<0.000000e+00> : vector<16x5xf32>
    %43 = tpu.matmul %42, %3, %cst_18 {dimension_numbers = #tpu.dot_dimension_numbers<[1], [0], [0], [1], [0, 0, 1, 1], [], []>} : vector<16x10xf32>, vector<10x5xf32>, vector<16x5xf32> -> vector<16x5xf32>
    %44 = vector.broadcast %4 : vector<1x5xf32> to vector<16x5xf32>
    %45 = arith.addf %43, %44 : vector<16x5xf32>
    %c0_19 = arith.constant 0 : index
    %c0_20 = arith.constant 0 : index
    %46 = vector.load %arg4[%c0_19, %c0_20] : memref<16x5xf32, #tpu.memory_space<vmem>>, vector<16x5xf32>
    tpu.vector_store %arg4[%c0_19, %c0_20], %45 {strides = array<i32>} : memref<16x5xf32, #tpu.memory_space<vmem>>, vector<16x5xf32>,
    %c0_21 = arith.constant 0 : index
    %c0_22 = arith.constant 0 : index
    %47 = vector.load %arg5[%c0_21, %c0_22] : memref<2x10xf32, #tpu.memory_space<vmem>>, vector<2x10xf32>
    tpu.vector_store %arg5[%c0_21, %c0_22], %41 {strides = array<i32>} : memref<2x10xf32, #tpu.memory_space<vmem>>, vector<2x10xf32>,
    return
  }
}

</mosaic_0001>

<bundles_post_ra>
// kernel: rnn_forward.1
= control target key start
LH: loop header
LB: loop body
LE: loop exit
PB: predicated region body
PF: predicated region fallthrough
CT: control target
= control target key end

     0   :  { %vm44_vm0 = vcmask 1043456   ;;  %vm76_vm1 = vcmask 1041408   ;;  %vm72_vm2 = vcmask 80896   ;;  %s553_s0 = inlined_call_operand.vmem [shape: f32[16,60], index: 0, kind: input, shape index: {}]   ;;  %s554_s1 = inlined_call_operand.vmem [shape: f32[2,10], index: 1, kind: input, shape index: {}]   ;;  %s555_s2 = inlined_call_operand.vmem [shape: f32[71,10], index: 2, kind: input, shape index: {}]   ;;  %s556_s3 = inlined_call_operand.vmem [shape: f32[11,5], index: 3, kind: input, shape index: {}]   ;;  %s557_s4 = inlined_call_operand.vmem [shape: f32[16,5], index: 4, kind: output, shape index: {0}]   ;;  %s558_s5 = inlined_call_operand.hbm [shape: f32[2,10], index: 5, kind: output, shape index: {1}]  }
   0x1   :  { %v27_v0 = vld [vmem:[%s555_s2 + $0x38] sm:$0xf]  ;;  %v26_v1 = vld [vmem:[%s555_s2 + $0x30] sm:$0xff]  ;;  %v25_v2 = vld [vmem:[%s555_s2 + $0x28] sm:$0xff] }
   0x2   :  { %365 = vmatpush.msk.msra.mxu0 %vm44_vm0, %v27_v0  ;;  %v29_v3 = vld [vmem:[%s555_s2 + $0x44] sm:$0x3]  ;;  %v28_v4 = vld [vmem:[%s555_s2 + $0x3c] sm:$0xff] }
   0x3   :  { %368 = vmatpush.msk.msra.mxu1 %vm76_vm1, %v29_v3  ;;  %v71_v5 = vld [vmem:[%s554_s1] sm:$0x3]  ;;  %370 = vmatpush.msk.msra.mxu2 %vm76_vm1, %v29_v3 }
   0x4   :  { %57 = vmatpush.msra.mxu0 %v26_v1  ;;  %v24_v6 = vld [vmem:[%s555_s2 + $0x20] sm:$0xff]  ;;  %372 = vmatpush.msk.msra.mxu3 %vm76_vm1, %v29_v3 }
   0x5   :  { %95 = vmatpush.msra.mxu1 %v28_v4 }
   0x6   :  { %58 = vmatpush.msra.mxu0 %v25_v2 }
   0x7   :  { %11 = vsyncpa [#allocation3], 0  ;;  %v23_v7 = vld [vmem:[%s555_s2 + $0x18] sm:$0xff]  ;;  %369 = vmatmul.msk.f32.vlgmr.msra.gmra.mxu1 %vm72_vm2, %v71_v5  ;;  %120 = vmatpush.msra.mxu2 %v28_v4  ;;  %v22_v8 = vld [vmem:[%s555_s2 + $0x10] sm:$0xff]  ;;  %vm37_vm3 = vcmask 490496   ;;  %vm302_vm4 = vcmask 1045504  }
   0x8   :  { %59 = vmatpush.msra.mxu0 %v24_v6  ;;  %149 = vmatpush.msra.mxu3 %v28_v4  ;;  %v21_v9 = vld [vmem:[%s555_s2 + $0x8] sm:$0xff]  ;;  %v20_v10 = vld [vmem:[%s555_s2] sm:$0xff]  ;;  %vm340_vm5 = vcmask 39936   ;;  %vm343_vm6 = vcmask 80902   ;;  %s354_s29 = sshll.u32 %s558_s5, 4  ;;  %s355_s29 = int_to_ptr.hbm [resolvable:$true] %s354_s29 }
   0x9   :  { %374 = vmatpush.msk.msrb.mxu1 %vm76_vm1, %v29_v3  ;;  %376 = vmatpush.msk.msrb.mxu2 %vm76_vm1, %v29_v3  ;;  %v34_v11 = vld [vmem:[%s553_s0] sm:$0xff]  ;;  %v35_v30 = vld [vmem:[%s553_s0 + $0x8] sm:$0xff] }
   0xa   :  { %60 = vmatpush.msra.mxu0 %v23_v7  ;;  %378 = vmatpush.msk.msrb.mxu3 %vm76_vm1, %v29_v3  ;;  %v388_v12 = vld [vmem:[%s555_s2 + $0x46] ss:$0 sm:$0xff]  ;;  %v32_v37 = vld [vmem:[%s556_s3 + $0x8] sm:$0x3]  ;;  %v389_v47 = vld [vmem:[%s556_s3 + $0xa] ss:$0 sm:$0xff] }
   0xb   :  { %178 = vmatpush.msrb.mxu1 %v28_v4  ;;  %207 = vmatpush.msrb.mxu2 %v28_v4  ;;  %v31_v38 = vld [vmem:[%s556_s3] sm:$0xff]  ;;  %s432_s3 = smov [#allocation2]  }
   0xc   :  { %61 = vmatpush.msra.mxu0 %v22_v8  ;;  %232 = vmatpush.msrb.mxu3 %v28_v4  ;;  %s352_s26 = sshll.u32 %s432_s3, 4  ;;  %s353_s26 = int_to_ptr.vmem [resolvable:$true] %s352_s26 }
   0xd   :  { %380 = vmatpush.msk.msra.mxu1 %vm76_vm1, %v29_v3 }
   0xe   :  { %62 = vmatpush.msra.mxu0 %v21_v9 }
   0xf   :  { %261 = vmatpush.msra.mxu1 %v28_v4 }
  0x10   :  { %63 = vmatpush.msra.mxu0 %v20_v10 }
  0x11   :  { %366 = vmatmul.msk.f32.vlgmr.msra.gmra.mxu0 %vm37_vm3, %v34_v11 }
  0x19   :  { %367 = vmatmul.msk.f32.gmra.mxu0 %vm37_vm3, %v35_v30 }
  0x84   :  { %v97_v14 = vpop.f32.mrf.mxu1 }
  0x8e   :  { %v65_v13 = vpop.f32.mrf.mxu0 }
  0x8f   :  { %v66_v15 = vadd.f32 %v388_v12, %v65_v13 }
  0x91   :  { %v100_v16 = vadd.f32 %v97_v14, %v66_v15 }
  0x93   :  { %390 = vtanh.f32 %v100_v16 }
  0x96   :  { %v68_v39 = vpop.f32.mrf.mxu0 }
  0x97   :  { %v69_v40 = vadd.f32 %v388_v12, %v68_v39 }
  0x99   :  { %v391_v17 = vpop.eup %390 }
  0x9a   :  { %371 = vmatmul.msk.f32.vlgmr.msra.gmra.mxu2 %vm72_vm2, %v391_v17 }
  0x9b   :  { %382 = vmatpush.msk.msra.mxu2 %vm76_vm1, %v29_v3 }
  0x9d   :  { %290 = vmatpush.msra.mxu2 %v28_v4 }
 0x11d   :  { %v122_v18 = vpop.f32.mrf.mxu2 }
 0x11e   :  { %v126_v19 = vrot.slane %v122_v18, 6 }
 0x120   :  { %v128_v20 = vadd.f32 %v126_v19, %v66_v15 }
 0x122   :  { %392 = vtanh.f32 %v128_v20 }
 0x128   :  { %v393_v21 = vpop.eup %392 }
 0x129   :  { %v131_v22 = vrot.slane %v393_v21, 2  ;;  %v300_v27 = vsel %vm76_vm1, %v391_v17, %v393_v21 }
 0x12b   :  { %373 = vmatmul.msk.f32.vlgmr.msra.gmra.mxu3 %vm72_vm2, %v131_v22 }
 0x12c   :  { %384 = vmatpush.msk.msra.mxu3 %vm76_vm1, %v32_v37 }
 0x12e   :  { %332 = vmatpush.msra.mxu3 %v31_v38 }
 0x1ae   :  { %v151_v23 = vpop.f32.mrf.mxu3 }
 0x1af   :  { %v155_v24 = vrot.slane %v151_v23, 4 }
 0x1b1   :  { %v157_v25 = vadd.f32 %v155_v24, %v66_v15 }
 0x1b3   :  { %394 = vtanh.f32 %v157_v25 }
 0x1b9   :  { %v395_v26 = vpop.eup %394 }
 0x1ba   :  { %v160_v28 = vrot.slane %v395_v26, 4  ;;  %v301_v29 = vsel %vm44_vm0, %v300_v27, %v395_v26 }
 0x1bc   :  { %375 = vmatmul.msk.f32.vlgmr.msrb.gmra.mxu1 %vm72_vm2, %v160_v28 }
 0x239   :  { %v180_v31 = vpop.f32.mrf.mxu1 }
 0x23a   :  { %v184_v32 = vrot.slane %v180_v31, 2 }
 0x23c   :  { %v186_v33 = vadd.f32 %v184_v32, %v66_v15 }
 0x23e   :  { %396 = vtanh.f32 %v186_v33 }
 0x244   :  { %v397_v34 = vpop.eup %396 }
 0x245   :  { %v189_v35 = vrot.slane %v397_v34, 6  ;;  %v303_v36 = vsel %vm302_vm4, %v301_v29, %v397_v34 }
 0x247   :  { %377 = vmatmul.msk.f32.vlgmr.msrb.gmra.mxu2 %vm72_vm2, %v189_v35 }
 0x2ca   :  { %v209_v41 = vpop.f32.mrf.mxu2 }
 0x2cb   :  { %v212_v42 = vadd.f32 %v209_v41, %v69_v40 }
 0x2cd   :  { %398 = vtanh.f32 %v212_v42 }
 0x2d3   :  { %v399_v43 = vpop.eup %398 }
 0x2d4   :  { %379 = vmatmul.msk.f32.vlgmr.msrb.gmra.mxu3 %vm72_vm2, %v399_v43 }
 0x2dc   :  { %385 = vmatmul.msk.f32.vlgmr.msra.gmra.mxu3 %vm72_vm2, %v303_v36 }
 0x357   :  { %v234_v44 = vpop.f32.mrf.mxu3 }
 0x358   :  { %v238_v45 = vrot.slane %v234_v44, 6 }
 0x35a   :  { %v240_v46 = vadd.f32 %v238_v45, %v69_v40 }
 0x35c   :  { %400 = vtanh.f32 %v240_v46 }
 0x35f   :  { %v334_v48 = vpop.f32.mrf.mxu3 }
 0x360   :  { %v335_v49 = vadd.f32 %v389_v47, %v334_v48 }
 0x362   :  { %v401_v50 = vpop.eup %400  ;;  %341 = vst.msk [vmem:[%s557_s4] sm:$0xff] %vm340_vm5, %v335_v49 }
 0x363   :  { %v243_v51 = vrot.slane %v401_v50, 2  ;;  %v304_v56 = vsel %vm76_vm1, %v399_v43, %v401_v50 }
 0x365   :  { %381 = vmatmul.msk.f32.vlgmr.msra.gmra.mxu1 %vm72_vm2, %v243_v51 }
 0x3e2   :  { %v263_v52 = vpop.f32.mrf.mxu1 }
 0x3e3   :  { %v267_v53 = vrot.slane %v263_v52, 4 }
 0x3e5   :  { %v269_v54 = vadd.f32 %v267_v53, %v69_v40 }
 0x3e7   :  { %402 = vtanh.f32 %v269_v54 }
 0x3ed   :  { %v403_v55 = vpop.eup %402 }
 0x3ee   :  { %v272_v57 = vrot.slane %v403_v55, 4  ;;  %v305_v58 = vsel %vm44_vm0, %v304_v56, %v403_v55 }
 0x3f0   :  { %383 = vmatmul.msk.f32.vlgmr.msra.gmra.mxu2 %vm72_vm2, %v272_v57 }
 0x473   :  { %v292_v59 = vpop.f32.mrf.mxu2 }
 0x474   :  { %v296_v60 = vrot.slane %v292_v59, 2 }
 0x476   :  { %v298_v61 = vadd.f32 %v296_v60, %v69_v40 }
 0x478   :  { %404 = vtanh.f32 %v298_v61 }
 0x47e   :  { %v405_v62 = vpop.eup %404 }
 0x47f   :  { %v306_v63 = vsel %vm302_vm4, %v305_v58, %v405_v62  ;;  %344 = vst.msk [vmem:[#allocation2 - $0x6] sm:$0xc0] %vm343_vm6, %v405_v62 }
 0x480   :  { %386 = vmatmul.msk.f32.gmra.mxu3 %vm72_vm2, %v306_v63  ;;  %357 = dma.vmem_to_hbm [thread:$0]  %s353_s26, 32, %s355_s29, [#allocation3]  }
 0x503   :  { %v337_v0 = vpop.f32.mrf.mxu3 }
 0x504   :  { %v338_v1 = vadd.f32 %v389_v47, %v337_v0 }
 0x506   :  { %342 = vst.msk [vmem:[%s557_s4 + $0x8] sm:$0xff] %vm340_vm5, %v338_v1 }
 0x507   :  { %430 = dma.done.wait [#allocation3], 32  }
 0x508   :  { %431 = vsyncadd [#allocation3], 4294967264 }
 0x509   :  { %364 = vsyncpa [#allocation3], 1 }

</bundles_post_ra>
